<compile_context>
chip_gen: v7x
topology: tpu7x:2x2x1
jax: 0.10.0
libtpu: 0.0.40
codegen_flags: <defaults>
</compile_context>

<pallas_src>
import functools

import jax
import jax.numpy as jnp
from jax.experimental import pallas as pl
from jax.experimental.pallas import tpu as pltpu


def _make_rnn_kernel(num_layers: int, hidden_dim: int, seq_len: int):
    """Wavefront RNN kernel: one MXU matmul + one tanh per wave (T+L-1 waves).

    Kernel ref order:
        x_ref, wx0_ref, b0_ref, wwave_ref, [bup_ref], wfc_ref, bfc_ref,
        out_ref, add_sc (VMEM scratch)
    """
    L, H, T = num_layers, hidden_dim, seq_len
    LH = L * H
    WV = T + L - 1                           # number of waves

    def kernel(*refs):
        if L > 1:
            (x_ref, wx0_ref, b0_ref, wwave_ref, bup_ref,
             wfc_ref, bfc_ref, out_ref, add_sc) = refs
        else:
            (x_ref, wx0_ref, b0_ref, wwave_ref,
             wfc_ref, bfc_ref, out_ref, add_sc) = refs
            bup_ref = None

        B = x_ref.shape[0]                   # sublane-padded batch
        D = x_ref.shape[2]

        # ----- One-time prologue (off the serial wave chain) ---------------------
        # Layer-0 input projection for ALL timesteps with a single MXU call,
        # layer-0 bias folded in once.
        x_flat = x_ref[...].reshape(B * T, D).astype(jnp.bfloat16)
        xproj = jnp.dot(x_flat, wx0_ref[...], preferred_element_type=jnp.float32)
        xproj = (xproj + b0_ref[...]).reshape(B, T, H)

        # Per-wave additive table, staged wave-major in VMEM so the wave loop only
        # does cheap leading-axis loads:
        #   lanes [0:H)         : x-projection for waves 0..T-1, 0 afterwards
        #   lanes [l*H:(l+1)*H) : b_l from wave l onwards, 0 before (keeps the
        #                         pre-start hidden state of layer l exactly 0)
        add_sc[...] = jnp.zeros((WV, B, LH), jnp.float32)
        for t in range(T):                   # prologue-only fill; not on the chain
            add_sc[t, :, 0:H] = xproj[:, t, :]
        if L > 1:
            bup = bup_ref[...]               # (1, (L-1)*H) fused biases, f32
            for l in range(1, L):
                b_l = bup[:, (l - 1) * H:l * H].reshape(1, 1, H)
                add_sc[l:WV, :, l * H:(l + 1) * H] = jnp.broadcast_to(
                    b_l, (WV - l, B, H))

        wwave = wwave_ref[...]               # (LH, LH) bf16 block weight, hoisted

        # ----- Wavefront recurrence: ONE matmul + one tanh per wave --------------
        # carry lanes [l*H:(l+1)*H) hold h_l; after the last wave the top-layer
        # lanes hold h_{L-1}(T-1).
        carry = jnp.zeros((B, LH), jnp.float32)
        for w in range(WV):                  # static unroll: T is small here
            pre = jnp.dot(carry.astype(jnp.bfloat16), wwave,
                          preferred_element_type=jnp.float32)
            carry = jnp.tanh(pre + add_sc[w])
        # TODO(synk): for seq_len >~ 32 switch to lax.fori_loop(..., unroll=True)
        # with the carry in a VMEM scratch to bound live ranges.

        # ----- Head: fc(h_{L-1}(T-1)); dropout(0.1) is identity in eval ----------
        h_top = carry[:, (L - 1) * H:LH]
        logits = jnp.dot(h_top.astype(jnp.bfloat16), wfc_ref[...],
                         preferred_element_type=jnp.float32) + bfc_ref[...]
        out_ref[...] = logits.astype(out_ref.dtype)   # lane-dense (B_pad, 128) store

    return kernel


def pack_params(params, compute_dtype=jnp.bfloat16):
    """One-time weight preprocessing (keep OUT of the per-call hot path).

    params: dict with
        'layers': list of (w_ih (H,in), w_hh (H,H), b_ih (H,), b_hh (H,)) per layer
        'fc_w':   (output_dim, H)
        'fc_b':   (output_dim,)
    """
    layers = params["layers"]
    L = len(layers)
    H = layers[0][0].shape[0]
    LH = L * H
    O = params["fc_w"].shape[0]
    O_pad = max(128, -(-O // 128) * 128)     # lane-dense output store

    w_ih0, _, b_ih0, b_hh0 = layers[0]

    # Block wavefront weight (L*H, L*H): carry @ wwave advances every layer at once.
    wwave = jnp.zeros((LH, LH), jnp.float32)
    for l in range(L):
        w_hh = jnp.asarray(layers[l][1])
        wwave = wwave.at[l * H:(l + 1) * H, l * H:(l + 1) * H].set(w_hh.T)
        if l + 1 < L:
            w_ih_next = jnp.asarray(layers[l + 1][0])
            wwave = wwave.at[l * H:(l + 1) * H, (l + 1) * H:(l + 2) * H].set(w_ih_next.T)

    fc_w_pad = jnp.zeros((H, O_pad), jnp.float32).at[:, :O].set(
        jnp.asarray(params["fc_w"]).T)
    fc_b_pad = jnp.zeros((1, O_pad), jnp.float32).at[0, :O].set(
        jnp.asarray(params["fc_b"]))

    packed = {
        "L": L, "H": H, "O": O,
        "wx0": jnp.asarray(w_ih0).T.astype(compute_dtype),                    # (D, H)
        "b0": (jnp.asarray(b_ih0) + jnp.asarray(b_hh0)).reshape(1, H).astype(jnp.float32),
        "wwave": wwave.astype(compute_dtype),                                 # (LH, LH)
        "fc_w": fc_w_pad.astype(compute_dtype),                               # (H, O_pad)
        "fc_b": fc_b_pad,                                                     # (1, O_pad)
    }
    if L > 1:
        bup = jnp.concatenate(
            [jnp.asarray(b_ih) + jnp.asarray(b_hh) for (_, _, b_ih, b_hh) in layers[1:]],
            axis=0).reshape(1, (L - 1) * H).astype(jnp.float32)
        packed["bup"] = bup
    return packed


def rnn_classifier_forward(x, packed):
    """Forward pass of RNNClassifier (eval mode).

    x:      (batch, seq, input_dim) float32
    packed: output of pack_params()
    returns (batch, output_dim) float32
    """
    B, T, D = x.shape
    L, H, O = packed["L"], packed["H"], packed["O"]
    LH = L * H
    O_pad = packed["fc_w"].shape[1]
    WV = T + L - 1

    # Sublane-align the batch (vreg/MXU rows come in multiples of 8); bigger real
    # batches are essentially free until B exceeds the MXU row count.
    B_pad = max(8, -(-B // 8) * 8)
    x_pad = jnp.pad(x, ((0, B_pad - B), (0, 0), (0, 0))) if B_pad != B else x

    kernel_inputs = [x_pad, packed["wx0"], packed["b0"], packed["wwave"]]
    if L > 1:
        kernel_inputs.append(packed["bup"])
    kernel_inputs += [packed["fc_w"], packed["fc_b"]]

    kernel = _make_rnn_kernel(L, H, T)
    vmem = functools.partial(pl.BlockSpec, memory_space=pltpu.MemorySpace.VMEM)

    # Single TensorCore invocation, no grid: everything fits VMEM at these shapes and
    # grid steps would only add serial overhead.  For large batches, tile B with a
    # ("parallel",) grid axis (2 TCs on v7x; re-derive the tile against 64 MiB VMEM).
    out = pl.pallas_call(
        kernel,
        out_shape=jax.ShapeDtypeStruct((B_pad, O_pad), jnp.float32),
        in_specs=[vmem() for _ in kernel_inputs],
        out_specs=vmem(),
        scratch_shapes=[pltpu.VMEM((WV, B_pad, LH), jnp.float32)],
    )(*kernel_inputs)
    return out[:B, :O]


def _init_params(key, input_dim, hidden_dim, layer_dim, output_dim):
    """Deterministic init mimicking PyTorch's uniform(-1/sqrt(H), 1/sqrt(H))."""
    bound = 1.0 / jnp.sqrt(hidden_dim)
    layers = []
    for l in range(layer_dim):
        in_dim = input_dim if l == 0 else hidden_dim
        key, k1, k2, k3, k4 = jax.random.split(key, 5)
        layers.append((
            jax.random.uniform(k1, (hidden_dim, in_dim), jnp.float32, -bound, bound),
            jax.random.uniform(k2, (hidden_dim, hidden_dim), jnp.float32, -bound, bound),
            jax.random.uniform(k3, (hidden_dim,), jnp.float32, -bound, bound),
            jax.random.uniform(k4, (hidden_dim,), jnp.float32, -bound, bound),
        ))
    key, k1, k2 = jax.random.split(key, 3)
    fc_w = jax.random.uniform(k1, (output_dim, hidden_dim), jnp.float32, -bound, bound)
    fc_b = jax.random.uniform(k2, (output_dim,), jnp.float32, -bound, bound)
    return {"layers": layers, "fc_w": fc_w, "fc_b": fc_b}


def _reference_forward(x, params):
    """Pure-JAX f32 reference for correctness checking."""
    B, T, D = x.shape
    H = params["layers"][0][0].shape[0]
    hs = [jnp.zeros((B, H), jnp.float32) for _ in params["layers"]]
    for t in range(T):
        inp = x[:, t, :]
        for l, (w_ih, w_hh, b_ih, b_hh) in enumerate(params["layers"]):
            hs[l] = jnp.tanh(inp @ w_ih.T + b_ih + hs[l] @ w_hh.T + b_hh)
            inp = hs[l]
    return hs[-1] @ params["fc_w"].T + params["fc_b"]


if __name__ == "__main__":
    # Small shapes consistent with the module: batch=2, seq=8, input_dim=16,
    # hidden_dim=32, layer_dim=2, output_dim=4.
    B, T, D, H, L, O = 2, 8, 16, 32, 2, 4

    key = jax.random.PRNGKey(0)
    key, kx, kp = jax.random.split(key, 3)
    x = jax.random.normal(kx, (B, T, D), jnp.float32)
    params = _init_params(kp, D, H, L, O)

    # One-time weight packing (transposes, bias fusion, block wavefront weight,
    # fc output padding, bf16 cast).
    packed = pack_params(params)

    out = rnn_classifier_forward(x, packed)
    out = jax.block_until_ready(out)

    ref = _reference_forward(x, params)
    assert out.shape == (B, O)
    # Tolerance accounts for bf16 MXU operands over the T-step recurrence
    # (accumulation stays f32; tanh saturation bounds the error).
    assert jnp.allclose(out, ref, atol=5e-2, rtol=5e-2), (out, ref)

    print("KERNEL_OK")
</pallas_src>

<mosaic_0001>
module attributes {stable_mosaic.version = 11 : i64} {
  func.func @kernel(%arg0: memref<8x8x16xf32, #tpu.memory_space<vmem>>, %arg1: memref<16x32xbf16, #tpu.memory_space<vmem>>, %arg2: memref<1x32xf32, #tpu.memory_space<vmem>>, %arg3: memref<64x64xbf16, #tpu.memory_space<vmem>>, %arg4: memref<1x32xf32, #tpu.memory_space<vmem>>, %arg5: memref<32x128xbf16, #tpu.memory_space<vmem>>, %arg6: memref<1x128xf32, #tpu.memory_space<vmem>>, %arg7: memref<8x128xf32, #tpu.memory_space<vmem>>, %arg8: memref<9x8x64xf32, #tpu.memory_space<vmem>>) attributes {dimension_semantics = [], scalar_prefetch = 0 : i64, scratch_operands = 1 : i64, tpu.core_type = #tpu.core_type<tc>} {
    %c0 = arith.constant 0 : index
    %c0_0 = arith.constant 0 : index
    %c0_1 = arith.constant 0 : index
    %0 = vector.load %arg0[%c0, %c0_0, %c0_1] : memref<8x8x16xf32, #tpu.memory_space<vmem>>, vector<8x8x16xf32>
    %1 = vector.shape_cast %0 : vector<8x8x16xf32> to vector<64x16xf32>
    %2 = arith.truncf %1 : vector<64x16xf32> to vector<64x16xbf16>
    %c0_2 = arith.constant 0 : index
    %c0_3 = arith.constant 0 : index
    %3 = vector.load %arg1[%c0_2, %c0_3] : memref<16x32xbf16, #tpu.memory_space<vmem>>, vector<16x32xbf16>
    %cst = arith.constant dense<0.000000e+00> : vector<64x32xf32>
    %4 = tpu.matmul %2, %3, %cst {dimension_numbers = #tpu.dot_dimension_numbers<[1], [0], [0], [1], [0, 0, 1, 1], [], []>} : vector<64x16xbf16>, vector<16x32xbf16>, vector<64x32xf32> -> vector<64x32xf32>
    %c0_4 = arith.constant 0 : index
    %c0_5 = arith.constant 0 : index
    %5 = vector.load %arg2[%c0_4, %c0_5] : memref<1x32xf32, #tpu.memory_space<vmem>>, vector<1x32xf32>
    %6 = vector.broadcast %5 : vector<1x32xf32> to vector<64x32xf32>
    %7 = arith.addf %4, %6 : vector<64x32xf32>
    %8 = vector.shape_cast %7 : vector<64x32xf32> to vector<8x8x32xf32>
    %cst_6 = arith.constant 0.000000e+00 : f32
    %9 = vector.broadcast %cst_6 : f32 to vector<9x8x64xf32>
    %c0_7 = arith.constant 0 : index
    %c0_8 = arith.constant 0 : index
    %c0_9 = arith.constant 0 : index
    %10 = vector.load %arg8[%c0_7, %c0_8, %c0_9] : memref<9x8x64xf32, #tpu.memory_space<vmem>>, vector<9x8x64xf32>
    tpu.vector_store %arg8[%c0_7, %c0_8, %c0_9], %9 {strides = array<i32>} : memref<9x8x64xf32, #tpu.memory_space<vmem>>, vector<9x8x64xf32>,
    %11 = vector.extract_strided_slice %8 {offsets = [0, 0, 0], sizes = [8, 1, 32], strides = [1, 1, 1]} : vector<8x8x32xf32> to vector<8x1x32xf32>
    %12 = vector.shape_cast %11 : vector<8x1x32xf32> to vector<8x32xf32>
    %c0_10 = arith.constant 0 : index
    %c0_11 = arith.constant 0 : index
    %c0_12 = arith.constant 0 : index
    %13 = vector.load %arg8[%c0_10, %c0_11, %c0_12] : memref<9x8x64xf32, #tpu.memory_space<vmem>>, vector<1x8x32xf32>
    %14 = vector.shape_cast %13 : vector<1x8x32xf32> to vector<8x32xf32>
    %15 = vector.shape_cast %12 : vector<8x32xf32> to vector<1x8x32xf32>
    tpu.vector_store %arg8[%c0_10, %c0_11, %c0_12], %15 {strides = array<i32>} : memref<9x8x64xf32, #tpu.memory_space<vmem>>, vector<1x8x32xf32>,
    %16 = vector.extract_strided_slice %8 {offsets = [0, 1, 0], sizes = [8, 1, 32], strides = [1, 1, 1]} : vector<8x8x32xf32> to vector<8x1x32xf32>
    %17 = vector.shape_cast %16 : vector<8x1x32xf32> to vector<8x32xf32>
    %c1 = arith.constant 1 : index
    %c0_13 = arith.constant 0 : index
    %c0_14 = arith.constant 0 : index
    %18 = vector.load %arg8[%c1, %c0_13, %c0_14] : memref<9x8x64xf32, #tpu.memory_space<vmem>>, vector<1x8x32xf32>
    %19 = vector.shape_cast %18 : vector<1x8x32xf32> to vector<8x32xf32>
    %20 = vector.shape_cast %17 : vector<8x32xf32> to vector<1x8x32xf32>
    tpu.vector_store %arg8[%c1, %c0_13, %c0_14], %20 {strides = array<i32>} : memref<9x8x64xf32, #tpu.memory_space<vmem>>, vector<1x8x32xf32>,
    %21 = vector.extract_strided_slice %8 {offsets = [0, 2, 0], sizes = [8, 1, 32], strides = [1, 1, 1]} : vector<8x8x32xf32> to vector<8x1x32xf32>
    %22 = vector.shape_cast %21 : vector<8x1x32xf32> to vector<8x32xf32>
    %c2 = arith.constant 2 : index
    %c0_15 = arith.constant 0 : index
    %c0_16 = arith.constant 0 : index
    %23 = vector.load %arg8[%c2, %c0_15, %c0_16] : memref<9x8x64xf32, #tpu.memory_space<vmem>>, vector<1x8x32xf32>
    %24 = vector.shape_cast %23 : vector<1x8x32xf32> to vector<8x32xf32>
    %25 = vector.shape_cast %22 : vector<8x32xf32> to vector<1x8x32xf32>
    tpu.vector_store %arg8[%c2, %c0_15, %c0_16], %25 {strides = array<i32>} : memref<9x8x64xf32, #tpu.memory_space<vmem>>, vector<1x8x32xf32>,
    %26 = vector.extract_strided_slice %8 {offsets = [0, 3, 0], sizes = [8, 1, 32], strides = [1, 1, 1]} : vector<8x8x32xf32> to vector<8x1x32xf32>
    %27 = vector.shape_cast %26 : vector<8x1x32xf32> to vector<8x32xf32>
    %c3 = arith.constant 3 : index
    %c0_17 = arith.constant 0 : index
    %c0_18 = arith.constant 0 : index
    %28 = vector.load %arg8[%c3, %c0_17, %c0_18] : memref<9x8x64xf32, #tpu.memory_space<vmem>>, vector<1x8x32xf32>
    %29 = vector.shape_cast %28 : vector<1x8x32xf32> to vector<8x32xf32>
    %30 = vector.shape_cast %27 : vector<8x32xf32> to vector<1x8x32xf32>
    tpu.vector_store %arg8[%c3, %c0_17, %c0_18], %30 {strides = array<i32>} : memref<9x8x64xf32, #tpu.memory_space<vmem>>, vector<1x8x32xf32>,
    %31 = vector.extract_strided_slice %8 {offsets = [0, 4, 0], sizes = [8, 1, 32], strides = [1, 1, 1]} : vector<8x8x32xf32> to vector<8x1x32xf32>
    %32 = vector.shape_cast %31 : vector<8x1x32xf32> to vector<8x32xf32>
    %c4 = arith.constant 4 : index
    %c0_19 = arith.constant 0 : index
    %c0_20 = arith.constant 0 : index
    %33 = vector.load %arg8[%c4, %c0_19, %c0_20] : memref<9x8x64xf32, #tpu.memory_space<vmem>>, vector<1x8x32xf32>
    %34 = vector.shape_cast %33 : vector<1x8x32xf32> to vector<8x32xf32>
    %35 = vector.shape_cast %32 : vector<8x32xf32> to vector<1x8x32xf32>
    tpu.vector_store %arg8[%c4, %c0_19, %c0_20], %35 {strides = array<i32>} : memref<9x8x64xf32, #tpu.memory_space<vmem>>, vector<1x8x32xf32>,
    %36 = vector.extract_strided_slice %8 {offsets = [0, 5, 0], sizes = [8, 1, 32], strides = [1, 1, 1]} : vector<8x8x32xf32> to vector<8x1x32xf32>
    %37 = vector.shape_cast %36 : vector<8x1x32xf32> to vector<8x32xf32>
    %c5 = arith.constant 5 : index
    %c0_21 = arith.constant 0 : index
    %c0_22 = arith.constant 0 : index
    %38 = vector.load %arg8[%c5, %c0_21, %c0_22] : memref<9x8x64xf32, #tpu.memory_space<vmem>>, vector<1x8x32xf32>
    %39 = vector.shape_cast %38 : vector<1x8x32xf32> to vector<8x32xf32>
    %40 = vector.shape_cast %37 : vector<8x32xf32> to vector<1x8x32xf32>
    tpu.vector_store %arg8[%c5, %c0_21, %c0_22], %40 {strides = array<i32>} : memref<9x8x64xf32, #tpu.memory_space<vmem>>, vector<1x8x32xf32>,
    %41 = vector.extract_strided_slice %8 {offsets = [0, 6, 0], sizes = [8, 1, 32], strides = [1, 1, 1]} : vector<8x8x32xf32> to vector<8x1x32xf32>
    %42 = vector.shape_cast %41 : vector<8x1x32xf32> to vector<8x32xf32>
    %c6 = arith.constant 6 : index
    %c0_23 = arith.constant 0 : index
    %c0_24 = arith.constant 0 : index
    %43 = vector.load %arg8[%c6, %c0_23, %c0_24] : memref<9x8x64xf32, #tpu.memory_space<vmem>>, vector<1x8x32xf32>
    %44 = vector.shape_cast %43 : vector<1x8x32xf32> to vector<8x32xf32>
    %45 = vector.shape_cast %42 : vector<8x32xf32> to vector<1x8x32xf32>
    tpu.vector_store %arg8[%c6, %c0_23, %c0_24], %45 {strides = array<i32>} : memref<9x8x64xf32, #tpu.memory_space<vmem>>, vector<1x8x32xf32>,
    %46 = vector.extract_strided_slice %8 {offsets = [0, 7, 0], sizes = [8, 1, 32], strides = [1, 1, 1]} : vector<8x8x32xf32> to vector<8x1x32xf32>
    %47 = vector.shape_cast %46 : vector<8x1x32xf32> to vector<8x32xf32>
    %c7 = arith.constant 7 : index
    %c0_25 = arith.constant 0 : index
    %c0_26 = arith.constant 0 : index
    %48 = vector.load %arg8[%c7, %c0_25, %c0_26] : memref<9x8x64xf32, #tpu.memory_space<vmem>>, vector<1x8x32xf32>
    %49 = vector.shape_cast %48 : vector<1x8x32xf32> to vector<8x32xf32>
    %50 = vector.shape_cast %47 : vector<8x32xf32> to vector<1x8x32xf32>
    tpu.vector_store %arg8[%c7, %c0_25, %c0_26], %50 {strides = array<i32>} : memref<9x8x64xf32, #tpu.memory_space<vmem>>, vector<1x8x32xf32>,
    %c0_27 = arith.constant 0 : index
    %c0_28 = arith.constant 0 : index
    %51 = vector.load %arg4[%c0_27, %c0_28] : memref<1x32xf32, #tpu.memory_space<vmem>>, vector<1x32xf32>
    %52 = vector.shape_cast %51 : vector<1x32xf32> to vector<1x1x32xf32>
    %53 = vector.shape_cast %52 : vector<1x1x32xf32> to vector<1x1x32xf32>
    %54 = vector.broadcast %53 : vector<1x1x32xf32> to vector<8x8x32xf32>
    %c1_29 = arith.constant 1 : index
    %c0_30 = arith.constant 0 : index
    %c32 = arith.constant 32 : index
    %55 = vector.load %arg8[%c1_29, %c0_30, %c32] : memref<9x8x64xf32, #tpu.memory_space<vmem>>, vector<8x8x32xf32>
    tpu.vector_store %arg8[%c1_29, %c0_30, %c32], %54 {strides = array<i32>} : memref<9x8x64xf32, #tpu.memory_space<vmem>>, vector<8x8x32xf32>,
    %c0_31 = arith.constant 0 : index
    %c0_32 = arith.constant 0 : index
    %56 = vector.load %arg3[%c0_31, %c0_32] : memref<64x64xbf16, #tpu.memory_space<vmem>>, vector<64x64xbf16>
    %cst_33 = arith.constant 0.000000e+00 : f32
    %57 = vector.broadcast %cst_33 : f32 to vector<8x64xf32>
    %58 = arith.truncf %57 : vector<8x64xf32> to vector<8x64xbf16>
    %cst_34 = arith.constant dense<0.000000e+00> : vector<8x64xf32>
    %59 = tpu.matmul %58, %56, %cst_34 {dimension_numbers = #tpu.dot_dimension_numbers<[1], [0], [0], [1], [0, 0, 1, 1], [], []>} : vector<8x64xbf16>, vector<64x64xbf16>, vector<8x64xf32> -> vector<8x64xf32>
    %c0_35 = arith.constant 0 : index
    %c0_36 = arith.constant 0 : index
    %c0_37 = arith.constant 0 : index
    %60 = vector.load %arg8[%c0_35, %c0_36, %c0_37] : memref<9x8x64xf32, #tpu.memory_space<vmem>>, vector<1x8x64xf32>
    %61 = vector.shape_cast %60 : vector<1x8x64xf32> to vector<8x64xf32>
    %62 = arith.addf %59, %61 : vector<8x64xf32>
    %63 = math.tanh %62 : vector<8x64xf32>
    %64 = arith.truncf %63 : vector<8x64xf32> to vector<8x64xbf16>
    %cst_38 = arith.constant dense<0.000000e+00> : vector<8x64xf32>
    %65 = tpu.matmul %64, %56, %cst_38 {dimension_numbers = #tpu.dot_dimension_numbers<[1], [0], [0], [1], [0, 0, 1, 1], [], []>} : vector<8x64xbf16>, vector<64x64xbf16>, vector<8x64xf32> -> vector<8x64xf32>
    %c1_39 = arith.constant 1 : index
    %c0_40 = arith.constant 0 : index
    %c0_41 = arith.constant 0 : index
    %66 = vector.load %arg8[%c1_39, %c0_40, %c0_41] : memref<9x8x64xf32, #tpu.memory_space<vmem>>, vector<1x8x64xf32>
    %67 = vector.shape_cast %66 : vector<1x8x64xf32> to vector<8x64xf32>
    %68 = arith.addf %65, %67 : vector<8x64xf32>
    %69 = math.tanh %68 : vector<8x64xf32>
    %70 = arith.truncf %69 : vector<8x64xf32> to vector<8x64xbf16>
    %cst_42 = arith.constant dense<0.000000e+00> : vector<8x64xf32>
    %71 = tpu.matmul %70, %56, %cst_42 {dimension_numbers = #tpu.dot_dimension_numbers<[1], [0], [0], [1], [0, 0, 1, 1], [], []>} : vector<8x64xbf16>, vector<64x64xbf16>, vector<8x64xf32> -> vector<8x64xf32>
    %c2_43 = arith.constant 2 : index
    %c0_44 = arith.constant 0 : index
    %c0_45 = arith.constant 0 : index
    %72 = vector.load %arg8[%c2_43, %c0_44, %c0_45] : memref<9x8x64xf32, #tpu.memory_space<vmem>>, vector<1x8x64xf32>
    %73 = vector.shape_cast %72 : vector<1x8x64xf32> to vector<8x64xf32>
    %74 = arith.addf %71, %73 : vector<8x64xf32>
    %75 = math.tanh %74 : vector<8x64xf32>
    %76 = arith.truncf %75 : vector<8x64xf32> to vector<8x64xbf16>
    %cst_46 = arith.constant dense<0.000000e+00> : vector<8x64xf32>
    %77 = tpu.matmul %76, %56, %cst_46 {dimension_numbers = #tpu.dot_dimension_numbers<[1], [0], [0], [1], [0, 0, 1, 1], [], []>} : vector<8x64xbf16>, vector<64x64xbf16>, vector<8x64xf32> -> vector<8x64xf32>
    %c3_47 = arith.constant 3 : index
    %c0_48 = arith.constant 0 : index
    %c0_49 = arith.constant 0 : index
    %78 = vector.load %arg8[%c3_47, %c0_48, %c0_49] : memref<9x8x64xf32, #tpu.memory_space<vmem>>, vector<1x8x64xf32>
    %79 = vector.shape_cast %78 : vector<1x8x64xf32> to vector<8x64xf32>
    %80 = arith.addf %77, %79 : vector<8x64xf32>
    %81 = math.tanh %80 : vector<8x64xf32>
    %82 = arith.truncf %81 : vector<8x64xf32> to vector<8x64xbf16>
    %cst_50 = arith.constant dense<0.000000e+00> : vector<8x64xf32>
    %83 = tpu.matmul %82, %56, %cst_50 {dimension_numbers = #tpu.dot_dimension_numbers<[1], [0], [0], [1], [0, 0, 1, 1], [], []>} : vector<8x64xbf16>, vector<64x64xbf16>, vector<8x64xf32> -> vector<8x64xf32>
    %c4_51 = arith.constant 4 : index
    %c0_52 = arith.constant 0 : index
    %c0_53 = arith.constant 0 : index
    %84 = vector.load %arg8[%c4_51, %c0_52, %c0_53] : memref<9x8x64xf32, #tpu.memory_space<vmem>>, vector<1x8x64xf32>
    %85 = vector.shape_cast %84 : vector<1x8x64xf32> to vector<8x64xf32>
    %86 = arith.addf %83, %85 : vector<8x64xf32>
    %87 = math.tanh %86 : vector<8x64xf32>
    %88 = arith.truncf %87 : vector<8x64xf32> to vector<8x64xbf16>
    %cst_54 = arith.constant dense<0.000000e+00> : vector<8x64xf32>
    %89 = tpu.matmul %88, %56, %cst_54 {dimension_numbers = #tpu.dot_dimension_numbers<[1], [0], [0], [1], [0, 0, 1, 1], [], []>} : vector<8x64xbf16>, vector<64x64xbf16>, vector<8x64xf32> -> vector<8x64xf32>
    %c5_55 = arith.constant 5 : index
    %c0_56 = arith.constant 0 : index
    %c0_57 = arith.constant 0 : index
    %90 = vector.load %arg8[%c5_55, %c0_56, %c0_57] : memref<9x8x64xf32, #tpu.memory_space<vmem>>, vector<1x8x64xf32>
    %91 = vector.shape_cast %90 : vector<1x8x64xf32> to vector<8x64xf32>
    %92 = arith.addf %89, %91 : vector<8x64xf32>
    %93 = math.tanh %92 : vector<8x64xf32>
    %94 = arith.truncf %93 : vector<8x64xf32> to vector<8x64xbf16>
    %cst_58 = arith.constant dense<0.000000e+00> : vector<8x64xf32>
    %95 = tpu.matmul %94, %56, %cst_58 {dimension_numbers = #tpu.dot_dimension_numbers<[1], [0], [0], [1], [0, 0, 1, 1], [], []>} : vector<8x64xbf16>, vector<64x64xbf16>, vector<8x64xf32> -> vector<8x64xf32>
    %c6_59 = arith.constant 6 : index
    %c0_60 = arith.constant 0 : index
    %c0_61 = arith.constant 0 : index
    %96 = vector.load %arg8[%c6_59, %c0_60, %c0_61] : memref<9x8x64xf32, #tpu.memory_space<vmem>>, vector<1x8x64xf32>
    %97 = vector.shape_cast %96 : vector<1x8x64xf32> to vector<8x64xf32>
    %98 = arith.addf %95, %97 : vector<8x64xf32>
    %99 = math.tanh %98 : vector<8x64xf32>
    %100 = arith.truncf %99 : vector<8x64xf32> to vector<8x64xbf16>
    %cst_62 = arith.constant dense<0.000000e+00> : vector<8x64xf32>
    %101 = tpu.matmul %100, %56, %cst_62 {dimension_numbers = #tpu.dot_dimension_numbers<[1], [0], [0], [1], [0, 0, 1, 1], [], []>} : vector<8x64xbf16>, vector<64x64xbf16>, vector<8x64xf32> -> vector<8x64xf32>
    %c7_63 = arith.constant 7 : index
    %c0_64 = arith.constant 0 : index
    %c0_65 = arith.constant 0 : index
    %102 = vector.load %arg8[%c7_63, %c0_64, %c0_65] : memref<9x8x64xf32, #tpu.memory_space<vmem>>, vector<1x8x64xf32>
    %103 = vector.shape_cast %102 : vector<1x8x64xf32> to vector<8x64xf32>
    %104 = arith.addf %101, %103 : vector<8x64xf32>
    %105 = math.tanh %104 : vector<8x64xf32>
    %106 = arith.truncf %105 : vector<8x64xf32> to vector<8x64xbf16>
    %cst_66 = arith.constant dense<0.000000e+00> : vector<8x64xf32>
    %107 = tpu.matmul %106, %56, %cst_66 {dimension_numbers = #tpu.dot_dimension_numbers<[1], [0], [0], [1], [0, 0, 1, 1], [], []>} : vector<8x64xbf16>, vector<64x64xbf16>, vector<8x64xf32> -> vector<8x64xf32>
    %c8 = arith.constant 8 : index
    %c0_67 = arith.constant 0 : index
    %c0_68 = arith.constant 0 : index
    %108 = vector.load %arg8[%c8, %c0_67, %c0_68] : memref<9x8x64xf32, #tpu.memory_space<vmem>>, vector<1x8x64xf32>
    %109 = vector.shape_cast %108 : vector<1x8x64xf32> to vector<8x64xf32>
    %110 = arith.addf %107, %109 : vector<8x64xf32>
    %111 = math.tanh %110 : vector<8x64xf32>
    %112 = vector.extract_strided_slice %111 {offsets = [0, 32], sizes = [8, 32], strides = [1, 1]} : vector<8x64xf32> to vector<8x32xf32>
    %113 = arith.truncf %112 : vector<8x32xf32> to vector<8x32xbf16>
    %c0_69 = arith.constant 0 : index
    %c0_70 = arith.constant 0 : index
    %114 = vector.load %arg5[%c0_69, %c0_70] : memref<32x128xbf16, #tpu.memory_space<vmem>>, vector<32x128xbf16>
    %cst_71 = arith.constant dense<0.000000e+00> : vector<8x128xf32>
    %115 = tpu.matmul %113, %114, %cst_71 {dimension_numbers = #tpu.dot_dimension_numbers<[1], [0], [0], [1], [0, 0, 1, 1], [], []>} : vector<8x32xbf16>, vector<32x128xbf16>, vector<8x128xf32> -> vector<8x128xf32>
    %c0_72 = arith.constant 0 : index
    %c0_73 = arith.constant 0 : index
    %116 = vector.load %arg6[%c0_72, %c0_73] : memref<1x128xf32, #tpu.memory_space<vmem>>, vector<1x128xf32>
    %117 = vector.broadcast %116 : vector<1x128xf32> to vector<8x128xf32>
    %118 = arith.addf %115, %117 : vector<8x128xf32>
    %c0_74 = arith.constant 0 : index
    %c0_75 = arith.constant 0 : index
    %119 = vector.load %arg7[%c0_74, %c0_75] : memref<8x128xf32, #tpu.memory_space<vmem>>, vector<8x128xf32>
    tpu.vector_store %arg7[%c0_74, %c0_75], %118 {strides = array<i32>} : memref<8x128xf32, #tpu.memory_space<vmem>>, vector<8x128xf32>,
    return
  }
}

</mosaic_0001>

<bundles_post_ra>
// kernel: tpu_custom_call.1
= control target key start
LH: loop header
LB: loop body
LE: loop exit
PB: predicated region body
PF: predicated region fallthrough
CT: control target
= control target key end

     0   :  { %12 = vsyncpa [#allocation4], 0  ;;  %s1530_s0 = inlined_call_operand.hbm [shape: f32[8,8,16], index: 0, kind: input, shape index: {}]   ;;  %s1531_s1 = inlined_call_operand.hbm [shape: bf16[16,32], index: 1, kind: input, shape index: {}]   ;;  %s1532_s2 = inlined_call_operand.vmem [shape: f32[1,32], index: 2, kind: input, shape index: {}]   ;;  %s1533_s3 = inlined_call_operand.hbm [shape: bf16[64,64], index: 3, kind: input, shape index: {}]   ;;  %s1534_s4 = inlined_call_operand.vmem [shape: f32[1,32], index: 4, kind: input, shape index: {}]   ;;  %s1535_s5 = inlined_call_operand.vmem [shape: bf16[32,128], index: 5, kind: input, shape index: {}]   ;;  %s1536_s6 = inlined_call_operand.vmem [shape: f32[1,128], index: 6, kind: input, shape index: {}]   ;;  %s1537_s7 = inlined_call_operand.hbm [shape: f32[8,128], index: 7, kind: output, shape index: {}]  }
   0x1   :  { %13 = vsyncpa [#allocation7], 0 }
   0x2   :  { %14 = vsyncpa [#allocation5], 0  ;;  %s1192_s24 = smov [#allocation6]   ;;  %s1098_s28 = scalar_lea.hbm %s1531_s1, 128 }
   0x3   :  { %s32_s25 = sshll.u32 %s1192_s24, 4  ;;  %p1099_p0 = scmp.ne.s32.totalorder %s1531_s1, %s1098_s28  ;;  %s33_s25 = int_to_ptr.vmem [resolvable:$true] %s32_s25 }
   0x4   :  { %p1102_p1 = scmp.lt.u32.totalorder %s1098_s28, %s1531_s1 }
   0x6   :  { %p1104_p2 = pnand %p1102_p1, %p1099_p0 }
   0x8   :  { %1107 = shalt.err (!%p1104_p2)
}
   0x9   :  { %s1108_s10 = scalar_lea.vmem %s33_s25, 128  ;;  %p1113_p4 = scmp.lt.s32.totalorder %s33_s25, %s33_s25 }
   0xa   :  { %p1109_p3 = scmp.ne.s32.totalorder %s33_s25, %s1108_s10  ;;  %p1114_p5 = scmp.lt.s32.totalorder %s1108_s10, %s1108_s10 }
   0xc   :  { %p1115_p6 = por %p1114_p5, %p1113_p4 }
   0xe   :  { %p1116_p7 = pnand %p1115_p6, %p1109_p3 }
  0x10   :  { %1119 = shalt.err (!%p1116_p7)
}
  0x11   :  { %s1193_s11 = smov 64   ;;  %s1194_s12 = smov 4  }
  0x12   :  { %38 = dma.hbm_to_vmem [thread:$0]  %s1531_s1, 128, %s33_s25, [#allocation7], %s1193_s11, %s1193_s11, %s1194_s12  }
  0x13   :  { %s1195_s15 = smov [#allocation3]   ;;  %s1120_s19 = scalar_lea.hbm %s1530_s0, 1024 }
  0x14   :  { %s20_s16 = sshll.u32 %s1195_s15, 4  ;;  %p1121_p8 = scmp.ne.s32.totalorder %s1530_s0, %s1120_s19  ;;  %s21_s16 = int_to_ptr.vmem [resolvable:$true] %s20_s16 }
  0x15   :  { %p1124_p9 = scmp.lt.u32.totalorder %s1120_s19, %s1530_s0 }
  0x17   :  { %p1126_p10 = pnand %p1124_p9, %p1121_p8 }
  0x19   :  { %1129 = shalt.err (!%p1126_p10)
}
  0x1a   :  { %s1130_s24 = scalar_lea.vmem %s21_s16, 1024  ;;  %p1135_p12 = scmp.lt.s32.totalorder %s21_s16, %s21_s16 }
  0x1b   :  { %p1131_p11 = scmp.ne.s32.totalorder %s21_s16, %s1130_s24  ;;  %p1136_p13 = scmp.lt.s32.totalorder %s1130_s24, %s1130_s24 }
  0x1d   :  { %p1137_p0 = por %p1136_p13, %p1135_p12 }
  0x1f   :  { %p1138_p1 = pnand %p1137_p0, %p1131_p11 }
  0x21   :  { %1141 = shalt.err (!%p1138_p1)
}
  0x22   :  { %s1196_s1 = smov 128   ;;  %s1197_s25 = smov 8  }
  0x23   :  { %26 = dma.hbm_to_vmem [thread:$0]  %s1530_s0, 1024, %s21_s16, [#allocation4], %s1196_s1, %s1196_s1, %s1197_s25  }
  0x24   :  { %s1198_s28 = smov [#allocation8]   ;;  %s1142_s9 = scalar_lea.hbm %s1533_s3, 512 }
  0x25   :  { %s46_s29 = sshll.u32 %s1198_s28, 4  ;;  %p1143_p2 = scmp.ne.s32.totalorder %s1533_s3, %s1142_s9  ;;  %s47_s29 = int_to_ptr.vmem [resolvable:$true] %s46_s29 }
  0x26   :  { %p1146_p3 = scmp.lt.u32.totalorder %s1142_s9, %s1533_s3 }
  0x28   :  { %p1148_p4 = pnand %p1146_p3, %p1143_p2 }
  0x2a   :  { %1151 = shalt.err (!%p1148_p4)
}
  0x2b   :  { %s1152_s17 = scalar_lea.vmem %s47_s29, 512  ;;  %p1157_p6 = scmp.lt.s32.totalorder %s47_s29, %s47_s29 }
  0x2c   :  { %p1153_p5 = scmp.ne.s32.totalorder %s47_s29, %s1152_s17  ;;  %p1158_p7 = scmp.lt.s32.totalorder %s1152_s17, %s1152_s17 }
  0x2e   :  { %p1159_p8 = por %p1158_p7, %p1157_p6 }
  0x30   :  { %p1160_p9 = pnand %p1159_p8, %p1153_p5 }
  0x32   :  { %1163 = shalt.err (!%p1160_p9)
}
  0x33   :  { %52 = dma.hbm_to_vmem [thread:$0]  %s1533_s3, 512, %s47_s29, [#allocation7], %s1193_s11, %s1193_s11, %s1194_s12  }
  0x34   :  { %1186 = dma.done.wait [#allocation4], 1024  }
  0x35   :  { %1187 = vsyncadd [#allocation4], 4294966272 }
  0x36   :  { %1188 = dma.done.wait [#allocation7], 640  }
  0x37   :  { %1189 = vsyncadd [#allocation7], 4294966656  ;;  %v1199_v0 = vmov 0.0   ;;  %vm1538_vm0 = vmmov 0   ;;  %v1073_v1 = vld [vmem:[#allocation6] sm:$0xff]   ;;  %v70_v3 = vld [vmem:[#allocation3 + $0x8] sm:$0xff] }
  0x38   :  { %944 = vmatprep.subr.bf16.mxu1 %v1199_v0  ;;  %952 = vmatprep.mubr.msk.bf16.mxu1 %vm1538_vm0, %v1199_v0  ;;  %v69_v2 = vld [vmem:[#allocation3] sm:$0xff]  ;;  %vm96_vm1 = vcmask 130048   ;;  %v71_v4 = vld [vmem:[#allocation3 + $0x10] sm:$0xff]  ;;  %v72_v6 = vld [vmem:[#allocation3 + $0x18] sm:$0xff]  ;;  %v1201_v18 = vmov 0   ;;  %vm1540_vm2 = vcmask 523264  }
  0x39   :  { %934 = vmatprep.subr.bf16.mxu0 %v1073_v1  ;;  %v77_v5 = vpack.c.bf16 %v70_v3, %v69_v2  ;;  %v73_v7 = vld [vmem:[#allocation3 + $0x20] sm:$0xff]  ;;  %v74_v8 = vld [vmem:[#allocation3 + $0x28] sm:$0xff]  ;;  %v78_v9 = vpack.c.bf16 %v72_v6, %v71_v4  ;;  %v75_v12 = vld [vmem:[#allocation3 + $0x30] sm:$0xff]  ;;  %175 = vst.msk [vmem:[#allocation2] sm:$0xff] %vm1540_vm2, %v1199_v0  ;;  %s1202_s12 = smov 32   ;;  %vm303_vm3 = vcmask 261127  }
  0x3a   :  { %935 = vmatpush3.bf16.msra.mxu0 %v1073_v1  ;;  %v79_v10 = vpack.c.bf16 %v74_v8, %v73_v7  ;;  %v1291_v11 = vld [vmem:[#allocation8] sm:$0xff]   ;;  %v1296_v13 = vld [vmem:[#allocation8 + $0x8] sm:$0xff]   ;;  %v76_v14 = vld [vmem:[#allocation3 + $0x38] sm:$0xff]  ;;  %176 = vst.msk [vmem:[#allocation2 + $0x8] sm:$0xff] %vm1540_vm2, %v1199_v0  ;;  %vm193_vm4 = vcmask 1041409   ;;  %vm196_vm5 = vcmask 1042434  }
  0x3b   :  { %936 = vmatprep.mubr.msk.bf16.mxu0 %vm96_vm1, %v77_v5  ;;  %956 = vmatprep.subr.bf16.mxu0 %v1199_v0  ;;  %v80_v15 = vpack.c.bf16 %v76_v14, %v75_v12  ;;  %v1303_v16 = vld [vmem:[#allocation8 + $0x10] sm:$0xff]   ;;  %v1310_v17 = vld [vmem:[#allocation8 + $0x18] sm:$0xff]   ;;  %177 = vst.msk [vmem:[#allocation2 + $0x10] sm:$0xff] %vm1540_vm2, %v1199_v0  ;;  %178 = vst.msk [vmem:[#allocation2 + $0x18] sm:$0xff] %vm1540_vm2, %v1199_v0  ;;  %vm199_vm6 = vcmask 1043459   ;;  %vm202_vm7 = vcmask 1044484  }
  0x3c   :  { %945 = vmatpush3.bf16.msra.mxu1 %v1291_v11  ;;  %179 = vst.msk [vmem:[#allocation2 + $0x20] sm:$0xff] %vm1540_vm2, %v1199_v0  ;;  %180 = vst.msk [vmem:[#allocation2 + $0x28] sm:$0xff] %vm1540_vm2, %v1199_v0  ;;  %v864_v19 = vld [vmem:[%s1534_s4] ss:$0 sm:$0xff]  ;;  %vm205_vm8 = vcmask 1045509   ;;  %vm208_vm9 = vcmask 1046534  }
  0x3d   :  { %937 = vmatmul.mubr.msk.bf16.vlgmr.msra.gmra.mrb[0].mxu0 %vm96_vm1, %v78_v9  ;;  %946 = vmatprep.subr.bf16.mxu1 %v1199_v0  ;;  %181 = vst.msk [vmem:[#allocation2 + $0x30] sm:$0xff] %vm1540_vm2, %v1199_v0  ;;  %182 = vst.msk [vmem:[#allocation2 + $0x38] sm:$0xff] %vm1540_vm2, %v1199_v0  ;;  %v858_v20 = vld [vmem:[%s1532_s2] ss:$0 sm:$0xff]  ;;  %vm211_vm10 = vcmask 1047559   ;;  %vm227_vm14 = vcmask 253952  }
  0x3e   :  { %940 = vmatprep.mubr.msk.bf16.mxu0 %vm96_vm1, %v79_v10  ;;  %957 = vmatpush3.bf16.msra.mxu0 %v1291_v11  ;;  %183 = vst.msk [vmem:[#allocation2 + $0x40] sm:$0xff] %vm1540_vm2, %v1199_v0  ;;  %vm240_vm15 = vcmask 254976   ;;  %vm266_vm13 = vcmask 257024   ;;  %vm279_vm12 = vcmask 258048   ;;  %vm292_vm11 = vcmask 259072   ;;  %s1203_s22 = smov 96  }
  0x3f   :  { %958 = vmatprep.subr.bf16.mxu0 %v1199_v0  ;;  %313 = vrot.lane.b32.xlu0 %v864_v19, %s1202_s12  ;;  %vm1543_vm2 = vcmask 261126  }
  0x40   :  { %947 = vmatpush3.bf16.msra.mxu1 %v1296_v13 }
  0x41   :  { %948 = vmatprep.subr.bf16.mxu1 %v1199_v0 }
  0x42   :  { %959 = vmatpush3.bf16.msra.mxu0 %v1296_v13 }
  0x43   :  { %960 = vmatprep.subr.bf16.mxu0 %v1199_v0 }
  0x44   :  { %949 = vmatpush3.bf16.msra.mxu1 %v1303_v16 }
  0x45   :  { %941 = vmatmul.mubr.msk.bf16.gmra.mrb[4].mxu0 %vm96_vm1, %v80_v15  ;;  %950 = vmatprep.subr.bf16.mxu1 %v1199_v0  ;;  %vm251_vm1 = vcmask 261123  }
  0x46   :  { %964 = vmatprep.mubr.msk.bf16.mxu0 %vm1538_vm0, %v1199_v0  ;;  %961 = vmatpush3.bf16.msra.mxu0 %v1303_v16 }
  0x47   :  { %962 = vmatprep.subr.bf16.mxu0 %v1199_v0 }
  0x48   :  { %951 = vmatpush3.bf16.msra.mxu1 %v1310_v17 }
  0x49   :  { %968 = vmatprep.subr.bf16.mxu1 %v1199_v0 }
  0x4a   :  { %963 = vmatpush3.bf16.msra.mxu0 %v1310_v17 }
  0x4b   :  { %953 = vmatmul.mubr.bf16.vlgmr.msra.gmra.mrb[0].mxu1 %v1201_v18  ;;  %980 = vmatprep.subr.bf16.mxu0 %v1199_v0 }
  0x4c   :  { %969 = vmatpush3.bf16.msra.mxu1 %v1291_v11  ;;  %976 = vmatprep.mubr.msk.bf16.mxu1 %vm1538_vm0, %v1199_v0  ;;  %vm214_vm0 = vcmask 261120  }
  0x4d   :  { %970 = vmatprep.subr.bf16.mxu1 %v1199_v0 }
  0x50   :  { %971 = vmatpush3.bf16.msra.mxu1 %v1296_v13 }
  0x51   :  { %972 = vmatprep.subr.bf16.mxu1 %v1199_v0 }
  0x54   :  { %973 = vmatpush3.bf16.msra.mxu1 %v1303_v16 }
  0x55   :  { %974 = vmatprep.subr.bf16.mxu1 %v1199_v0 }
  0x58   :  { %975 = vmatpush3.bf16.msra.mxu1 %v1310_v17 }
  0x59   :  { %992 = vmatprep.subr.bf16.mxu1 %v1199_v0 }
 0x110   :  { %v938_v21 = vpop.f32.mrb[0].mxu0 }
 0x111   :  { %v152_v22 = vadd.f32 %v938_v21, %v858_v20  ;;  %v143_v23 = vpop.f32.mrb[1].mxu0 }
 0x112   :  { %v1355_v24 = vadd.f32 %v858_v20, %v143_v23  ;;  %v939_v25 = vpop.f32.mrb[2].mxu0 }
 0x113   :  { %v155_v26 = vadd.f32 %v939_v25, %v858_v20  ;;  %v146_v27 = vpop.f32.mrb[3].mxu0  ;;  %v1358_v29 = vrot.slane %v152_v22, 6 }
 0x114   :  { %v147_v28 = vadd.f32 %v858_v20, %v146_v27  ;;  %304 = vst.msk [vmem:[#allocation2 + $0x31] sm:$0x80] %vm303_vm3, %v1355_v24  ;;  %vm253_vm3 = vcmask 256000  }
 0x115   :  { %v198_v30 = vrot.slane %v155_v26, 5 }
 0x116   :  { %v192_v31 = vrot.slane %v147_v28, 7 }
 0x117   :  { %v282_v32 = vsel %vm193_vm4, %v198_v30, %v1358_v29 }
 0x118   :  { %v194_v33 = vsel %vm193_vm4, %v192_v31, %v1355_v24  ;;  %v216_v34 = vsel %vm196_vm5, %v192_v31, %v1355_v24  ;;  %v229_v35 = vsel %vm199_vm6, %v192_v31, %v1355_v24  ;;  %v242_v36 = vsel %vm202_vm7, %v192_v31, %v1355_v24  ;;  %v942_v37 = vpop.f32.mrb[4].mxu0 }
 0x119   :  { %v197_v38 = vsel %vm196_vm5, %v1358_v29, %v194_v33  ;;  %v217_v39 = vsel %vm199_vm6, %v1358_v29, %v216_v34  ;;  %v230_v40 = vsel %vm202_vm7, %v1358_v29, %v229_v35  ;;  %v255_v41 = vsel %vm205_vm8, %v192_v31, %v1355_v24  ;;  %v159_v42 = vpop.f32.mrb[5].mxu0 }
 0x11a   :  { %v294_v43 = vsel %vm193_vm4, %v1358_v29, %v192_v31  ;;  %v168_v44 = vadd.f32 %v942_v37, %v858_v20  ;;  %v160_v45 = vadd.f32 %v858_v20, %v159_v42  ;;  %v200_v46 = vsel %vm199_vm6, %v198_v30, %v197_v38  ;;  %v943_v47 = vpop.f32.mrb[6].mxu0 }
 0x11b   :  { %v218_v48 = vsel %vm202_vm7, %v198_v30, %v217_v39  ;;  %v295_v49 = vsel %vm196_vm5, %v198_v30, %v294_v43  ;;  %v171_v50 = vadd.f32 %v943_v47, %v858_v20  ;;  %v162_v51 = vpop.f32.mrb[7].mxu0  ;;  %v231_v52 = vsel %vm205_vm8, %v198_v30, %v230_v40  ;;  %v314_v40 = vpop.permute.xlu0 %313 }
 0x11c   :  { %v207_v53 = vrot.slane %v168_v44, 2  ;;  %v201_v54 = vrot.slane %v160_v45, 4  ;;  %v163_v55 = vadd.f32 %v858_v20, %v162_v51  ;;  %v243_v56 = vsel %vm205_vm8, %v1358_v29, %v242_v36 }
 0x11d   :  { %v210_v57 = vrot.slane %v171_v50, 1  ;;  %v244_v58 = vsel %vm208_vm9, %v198_v30, %v243_v56  ;;  %v256_v59 = vsel %vm208_vm9, %v1358_v29, %v255_v41  ;;  %v268_v60 = vsel %vm208_vm9, %v192_v31, %v1355_v24 }
 0x11e   :  { %v203_v61 = vsel %vm202_vm7, %v201_v54, %v200_v46  ;;  %v219_v62 = vsel %vm205_vm8, %v201_v54, %v218_v48  ;;  %v270_v63 = vsel %vm193_vm4, %v201_v54, %v198_v30  ;;  %v283_v1 = vsel %vm196_vm5, %v201_v54, %v282_v32  ;;  %v395_v4 = vpop.f32.mrb[0].mxu1 }
 0x11f   :  { %v296_v2 = vsel %vm199_vm6, %v201_v54, %v295_v49  ;;  %v204_v3 = vrot.slane %v163_v55, 3  ;;  %228 = vst.msk [vmem:[#allocation2 + $0xf] sm:$0x1] %vm227_vm14, %v210_v57  ;;  %v232_v5 = vsel %vm208_vm9, %v201_v54, %v231_v52  ;;  %v234_v6 = vsel %vm193_vm4, %v210_v57, %v207_v53  ;;  %v954_v7 = vpop.f32.mrb[1].mxu1 }
 0x120   :  { %241 = vst.msk [vmem:[#allocation2 + $0x16] sm:$0x3] %vm240_vm15, %v234_v6  ;;  %v245_v8 = vsel %vm211_vm10, %v201_v54, %v244_v58  ;;  %v257_v9 = vsel %vm211_vm10, %v198_v30, %v256_v59  ;;  %v269_v10 = vsel %vm211_vm10, %v1358_v29, %v268_v60  ;;  %v281_v12 = vsel %vm211_vm10, %v192_v31, %v1355_v24  ;;  %v398_v20 = vpop.f32.mrb[2].mxu1 }
 0x121   :  { %v206_v14 = vsel %vm205_vm8, %v204_v3, %v203_v61  ;;  %v258_v15 = vsel %vm193_vm4, %v204_v3, %v201_v54  ;;  %v271_v18 = vsel %vm196_vm5, %v204_v3, %v270_v63  ;;  %v284_v19 = vsel %vm199_vm6, %v204_v3, %v283_v1  ;;  %252 = vst.msk [vmem:[#allocation2 + $0x15] sm:$0xf8] %vm251_vm1, %v245_v8  ;;  %v955_v23 = vpop.f32.mrb[3].mxu1 }
 0x122   :  { %vm1541_vm14 = vcmask 261124   ;;  %vm1542_vm15 = vcmask 261125   ;;  %291 = vst.msk [vmem:[#allocation2 + $0x2a] sm:$0xc0] %vm1543_vm2, %v281_v12  ;;  %v209_v21 = vsel %vm208_vm9, %v207_v53, %v206_v14  ;;  %v297_v22 = vsel %vm202_vm7, %v204_v3, %v296_v2 }
 0x123   :  { %265 = vst.msk [vmem:[#allocation2 + $0x1c] sm:$0xf0] %vm1541_vm14, %v257_v9  ;;  %v220_v24 = vsel %vm208_vm9, %v204_v3, %v219_v62  ;;  %v233_v25 = vsel %vm211_vm10, %v204_v3, %v232_v5  ;;  %v212_v26 = vsel %vm211_vm10, %v210_v57, %v209_v21  ;;  %vm1544_vm1 = vcmask 261122  }
 0x124   :  { %278 = vst.msk [vmem:[#allocation2 + $0x23] sm:$0xe0] %vm1542_vm15, %v269_v10  ;;  %v221_v27 = vsel %vm211_vm10, %v207_v53, %v220_v24  ;;  %v246_v28 = vsel %vm193_vm4, %v207_v53, %v204_v3  ;;  %v259_v29 = vsel %vm196_vm5, %v207_v53, %v258_v15  ;;  %vm1545_vm2 = vcmask 261121  }
 0x125   :  { %239 = vst.msk [vmem:[#allocation2 + $0xe] sm:$0xfc] %vm1544_vm1, %v233_v25  ;;  %v247_v30 = vsel %vm196_vm5, %v210_v57, %v246_v28  ;;  %v260_v31 = vsel %vm199_vm6, %v210_v57, %v259_v29  ;;  %v272_v32 = vsel %vm199_vm6, %v207_v53, %v271_v18  ;;  %v285_v33 = vsel %vm202_vm7, %v207_v53, %v284_v19 }
 0x126   :  { %215 = vst.msk [vmem:[#allocation2] sm:$0xff] %vm214_vm0, %v212_v26  ;;  %v273_v34 = vsel %vm202_vm7, %v210_v57, %v272_v32  ;;  %v286_v35 = vsel %vm205_vm8, %v210_v57, %v285_v33  ;;  %v298_v36 = vsel %vm205_vm8, %v207_v53, %v297_v22  ;;  %vm1546_vm4 = vcmask 260096  }
 0x127   :  { %226 = vst.msk [vmem:[#allocation2 + $0x7] sm:$0xfe] %vm1545_vm2, %v221_v27  ;;  %v299_v37 = vsel %vm208_vm9, %v210_v57, %v298_v36  ;;  %vm316_vm5 = vcmask 523520   ;;  %vm1547_vm6 = vcmask 523264   ;;  %vm1548_vm7 = vmmov 0   ;;  %v1078_v36 = vld [vmem:[%s1535_s5] sm:$0xff]  }
 0x128   :  { %254 = vst.msk [vmem:[#allocation2 + $0x1d] sm:$0x7] %vm253_vm3, %v247_v30  ;;  %vm1549_vm8 = vmmov %vm1547_vm6 }
 0x129   :  { %267 = vst.msk [vmem:[#allocation2 + $0x24] sm:$0xf] %vm266_vm13, %v260_v31  ;;  %vm1550_vm9 = vmmov %vm1547_vm6 }
 0x12a   :  { %280 = vst.msk [vmem:[#allocation2 + $0x2b] sm:$0x1f] %vm279_vm12, %v273_v34  ;;  %vm1551_vm10 = vmmov %vm1547_vm6 }
 0x12b   :  { %293 = vst.msk [vmem:[#allocation2 + $0x32] sm:$0x3f] %vm292_vm11, %v286_v35  ;;  %vm1552_vm11 = vmmov %vm1547_vm6 }
 0x12c   :  { %306 = vst.msk [vmem:[#allocation2 + $0x39] sm:$0x7f] %vm1546_vm4, %v299_v37  ;;  %vm1553_vm12 = vmmov %vm1547_vm6  ;;  %v1079_v37 = vld [vmem:[%s1535_s5 + $0x8] sm:$0xff]   ;;  %s1204_s5 = smov [#allocation9]  }
 0x12d   :  { %v333_v38 = vld [vmem:[#allocation2] sm:$0xff]  ;;  %317 = vst.msk [vmem:[#allocation2 + $0x8] sm:$0xff] %vm316_vm5, %v314_v40  ;;  %318 = vst.msk [vmem:[#allocation2 + $0x10] sm:$0xff] %vm316_vm5, %v314_v40  ;;  %s848_s1 = sshll.u32 %s1204_s5, 4  ;;  %s849_s1 = int_to_ptr.vmem [resolvable:$true] %s848_s1 }
 0x12e   :  { %v396_v39 = vadd.f32 %v395_v4, %v333_v38  ;;  %319 = vst.msk [vmem:[#allocation2 + $0x18] sm:$0xff] %vm316_vm5, %v314_v40  ;;  %320 = vst.msk [vmem:[#allocation2 + $0x20] sm:$0xff] %vm316_vm5, %v314_v40  ;;  %s1164_s25 = scalar_lea.vmem %s849_s1, 128  ;;  %p1169_p11 = scmp.lt.s32.totalorder %s849_s1, %s849_s1 }
 0x12f   :  { %321 = vst.msk [vmem:[#allocation2 + $0x28] sm:$0xff] %vm316_vm5, %v314_v40  ;;  %322 = vst.msk [vmem:[#allocation2 + $0x30] sm:$0xff] %vm316_vm5, %v314_v40  ;;  %p1165_p10 = scmp.ne.s32.totalorder %s849_s1, %s1164_s25  ;;  %p1170_p12 = scmp.lt.s32.totalorder %s1164_s25, %s1164_s25 }
 0x130   :  { %1080 = vtanh.f32 %v396_v39  ;;  %323 = vst.msk [vmem:[#allocation2 + $0x38] sm:$0xff] %vm316_vm5, %v314_v40  ;;  %324 = vst.msk [vmem:[#allocation2 + $0x40] sm:$0xff] %vm316_vm5, %v314_v40 }
 0x131   :  { %vm1554_vm13 = vmmov %vm1547_vm6  ;;  %p1171_p13 = por %p1170_p12, %p1169_p11 }
 0x132   :  { %vm1555_vm3 = vmmov %vm1547_vm6 }
 0x133   :  { %p1172_p0 = pnand %p1171_p13, %p1165_p10 }
 0x134   :  { %v403_v43 = vld [vmem:[#allocation2 + $0x8] sm:$0xff]  ;;  %v449_v51 = vld [vmem:[#allocation2 + $0x10] sm:$0xff] }
 0x135   :  { %v495_v59 = vld [vmem:[#allocation2 + $0x18] sm:$0xff]  ;;  %v541_v4 = vld [vmem:[#allocation2 + $0x20] sm:$0xff] }
 0x136   :  { %v587_v14 = vld [vmem:[#allocation2 + $0x28] sm:$0xff]  ;;  %v633_v24 = vld [vmem:[#allocation2 + $0x30] sm:$0xff] }
 0x137   :  { %v726_v38 = vld [vmem:[#allocation2 + $0x40] sm:$0xff] }
 0x13a   :  { %v1081_v41 = vpop.eup %1080 }
 0x13b   :  { %v402_v42 = vpack.c.bf16 %v1081_v41, %v1081_v41 }
 0x13d   :  { %965 = vmatmul.mubr.msk.bf16.vlgmr.msra.gmra.mrb[8].mxu0 %vm1547_vm6, %v402_v42 }
 0x13e   :  { %981 = vmatpush3.bf16.msra.mxu0 %v1291_v11  ;;  %988 = vmatprep.mubr.msk.bf16.mxu0 %vm1548_vm7, %v1199_v0 }
 0x13f   :  { %982 = vmatprep.subr.bf16.mxu0 %v1199_v0 }
 0x142   :  { %983 = vmatpush3.bf16.msra.mxu0 %v1296_v13 }
 0x143   :  { %984 = vmatprep.subr.bf16.mxu0 %v1199_v0 }
 0x146   :  { %985 = vmatpush3.bf16.msra.mxu0 %v1303_v16 }
 0x147   :  { %986 = vmatprep.subr.bf16.mxu0 %v1199_v0 }
 0x14a   :  { %987 = vmatpush3.bf16.msra.mxu0 %v1310_v17 }
 0x14b   :  { %1004 = vmatprep.subr.bf16.mxu0 %v1199_v0 }
 0x210   :  { %v441_v44 = vpop.f32.mrb[8].mxu0 }
 0x211   :  { %v442_v45 = vadd.f32 %v441_v44, %v403_v43  ;;  %v966_v46 = vpop.f32.mrb[9].mxu0 }
 0x212   :  { %v444_v47 = vpop.f32.mrb[10].mxu0 }
 0x213   :  { %1082 = vtanh.f32 %v442_v45  ;;  %v967_v48 = vpop.f32.mrb[11].mxu0  ;;  %v877_v47 = vld [vmem:[%s1536_s6] ss:$0 sm:$0xff] }
 0x21d   :  { %v1083_v49 = vpop.eup %1082 }
 0x21e   :  { %v448_v50 = vpack.c.bf16 %v1083_v49, %v1083_v49 }
 0x220   :  { %977 = vmatmul.mubr.msk.bf16.vlgmr.msra.gmra.mrb[4].mxu1 %vm1549_vm8, %v448_v50 }
 0x221   :  { %993 = vmatpush3.bf16.msra.mxu1 %v1291_v11  ;;  %1000 = vmatprep.mubr.msk.bf16.mxu1 %vm1548_vm7, %v1199_v0 }
 0x222   :  { %994 = vmatprep.subr.bf16.mxu1 %v1199_v0 }
 0x225   :  { %995 = vmatpush3.bf16.msra.mxu1 %v1296_v13 }
 0x226   :  { %996 = vmatprep.subr.bf16.mxu1 %v1199_v0 }
 0x229   :  { %997 = vmatpush3.bf16.msra.mxu1 %v1303_v16 }
 0x22a   :  { %998 = vmatprep.subr.bf16.mxu1 %v1199_v0 }
 0x22d   :  { %999 = vmatpush3.bf16.msra.mxu1 %v1310_v17 }
 0x22e   :  { %1016 = vmatprep.subr.bf16.mxu1 %v1199_v0 }
 0x2f3   :  { %v487_v52 = vpop.f32.mrb[4].mxu1 }
 0x2f4   :  { %v488_v53 = vadd.f32 %v487_v52, %v449_v51  ;;  %v978_v54 = vpop.f32.mrb[5].mxu1 }
 0x2f5   :  { %v490_v55 = vpop.f32.mrb[6].mxu1 }
 0x2f6   :  { %1084 = vtanh.f32 %v488_v53  ;;  %v979_v56 = vpop.f32.mrb[7].mxu1 }
 0x300   :  { %v1085_v57 = vpop.eup %1084 }
 0x301   :  { %v494_v58 = vpack.c.bf16 %v1085_v57, %v1085_v57 }
 0x303   :  { %989 = vmatmul.mubr.msk.bf16.vlgmr.msra.gmra.mrb[12].mxu0 %vm1550_vm9, %v494_v58 }
 0x304   :  { %1005 = vmatpush3.bf16.msra.mxu0 %v1291_v11  ;;  %1012 = vmatprep.mubr.msk.bf16.mxu0 %vm1548_vm7, %v1199_v0 }
 0x305   :  { %1006 = vmatprep.subr.bf16.mxu0 %v1199_v0 }
 0x308   :  { %1007 = vmatpush3.bf16.msra.mxu0 %v1296_v13 }
 0x309   :  { %1008 = vmatprep.subr.bf16.mxu0 %v1199_v0 }
 0x30c   :  { %1009 = vmatpush3.bf16.msra.mxu0 %v1303_v16 }
 0x30d   :  { %1010 = vmatprep.subr.bf16.mxu0 %v1199_v0 }
 0x310   :  { %1011 = vmatpush3.bf16.msra.mxu0 %v1310_v17 }
 0x311   :  { %1028 = vmatprep.subr.bf16.mxu0 %v1199_v0 }
 0x3d6   :  { %v533_v60 = vpop.f32.mrb[12].mxu0 }
 0x3d7   :  { %v534_v61 = vadd.f32 %v533_v60, %v495_v59  ;;  %v990_v62 = vpop.f32.mrb[13].mxu0 }
 0x3d8   :  { %v536_v63 = vpop.f32.mrb[14].mxu0 }
 0x3d9   :  { %1086 = vtanh.f32 %v534_v61  ;;  %v991_v1 = vpop.f32.mrb[15].mxu0 }
 0x3e3   :  { %v1087_v2 = vpop.eup %1086 }
 0x3e4   :  { %v540_v3 = vpack.c.bf16 %v1087_v2, %v1087_v2 }
 0x3e6   :  { %1001 = vmatmul.mubr.msk.bf16.vlgmr.msra.gmra.mrb[8].mxu1 %vm1551_vm10, %v540_v3 }
 0x3e7   :  { %1017 = vmatpush3.bf16.msra.mxu1 %v1291_v11  ;;  %1024 = vmatprep.mubr.msk.bf16.mxu1 %vm1548_vm7, %v1199_v0 }
 0x3e8   :  { %1018 = vmatprep.subr.bf16.mxu1 %v1199_v0 }
 0x3eb   :  { %1019 = vmatpush3.bf16.msra.mxu1 %v1296_v13 }
 0x3ec   :  { %1020 = vmatprep.subr.bf16.mxu1 %v1199_v0 }
 0x3ef   :  { %1021 = vmatpush3.bf16.msra.mxu1 %v1303_v16 }
 0x3f0   :  { %1022 = vmatprep.subr.bf16.mxu1 %v1199_v0 }
 0x3f3   :  { %1023 = vmatpush3.bf16.msra.mxu1 %v1310_v17 }
 0x3f4   :  { %1040 = vmatprep.subr.bf16.mxu1 %v1199_v0 }
 0x4b9   :  { %v579_v5 = vpop.f32.mrb[8].mxu1 }
 0x4ba   :  { %v580_v6 = vadd.f32 %v579_v5, %v541_v4  ;;  %v1002_v7 = vpop.f32.mrb[9].mxu1 }
 0x4bb   :  { %v582_v8 = vpop.f32.mrb[10].mxu1 }
 0x4bc   :  { %1088 = vtanh.f32 %v580_v6  ;;  %v1003_v9 = vpop.f32.mrb[11].mxu1 }
 0x4c6   :  { %v1089_v10 = vpop.eup %1088 }
 0x4c7   :  { %v586_v12 = vpack.c.bf16 %v1089_v10, %v1089_v10 }
 0x4c9   :  { %1013 = vmatmul.mubr.msk.bf16.vlgmr.msra.gmra.mrb[16].mxu0 %vm1552_vm11, %v586_v12 }
 0x4ca   :  { %1029 = vmatpush3.bf16.msra.mxu0 %v1291_v11  ;;  %1036 = vmatprep.mubr.msk.bf16.mxu0 %vm1548_vm7, %v1199_v0 }
 0x4cb   :  { %1030 = vmatprep.subr.bf16.mxu0 %v1199_v0 }
 0x4ce   :  { %1031 = vmatpush3.bf16.msra.mxu0 %v1296_v13 }
 0x4cf   :  { %1032 = vmatprep.subr.bf16.mxu0 %v1199_v0 }
 0x4d2   :  { %1033 = vmatpush3.bf16.msra.mxu0 %v1303_v16 }
 0x4d3   :  { %1034 = vmatprep.subr.bf16.mxu0 %v1199_v0 }
 0x4d6   :  { %1035 = vmatpush3.bf16.msra.mxu0 %v1310_v17 }
 0x4d7   :  { %1052 = vmatprep.subr.bf16.mxu0 %v1199_v0 }
 0x59c   :  { %v625_v15 = vpop.f32.mrb[16].mxu0 }
 0x59d   :  { %v626_v18 = vadd.f32 %v625_v15, %v587_v14  ;;  %v1014_v19 = vpop.f32.mrb[17].mxu0 }
 0x59e   :  { %v628_v20 = vpop.f32.mrb[18].mxu0 }
 0x59f   :  { %1090 = vtanh.f32 %v626_v18  ;;  %v1015_v21 = vpop.f32.mrb[19].mxu0 }
 0x5a9   :  { %v1091_v22 = vpop.eup %1090 }
 0x5aa   :  { %v632_v23 = vpack.c.bf16 %v1091_v22, %v1091_v22 }
 0x5ac   :  { %1025 = vmatmul.mubr.msk.bf16.vlgmr.msra.gmra.mrb[12].mxu1 %vm1553_vm12, %v632_v23 }
 0x5ad   :  { %1041 = vmatpush3.bf16.msra.mxu1 %v1291_v11  ;;  %1048 = vmatprep.mubr.msk.bf16.mxu1 %vm1548_vm7, %v1199_v0 }
 0x5ae   :  { %1042 = vmatprep.subr.bf16.mxu1 %v1199_v0 }
 0x5b1   :  { %1043 = vmatpush3.bf16.msra.mxu1 %v1296_v13  ;;  %v679_v13 = vld [vmem:[#allocation2 + $0x38] sm:$0xff] }
 0x5b2   :  { %1044 = vmatprep.subr.bf16.mxu1 %v1199_v0 }
 0x5b5   :  { %1045 = vmatpush3.bf16.msra.mxu1 %v1303_v16 }
 0x5b6   :  { %1046 = vmatprep.subr.bf16.mxu1 %v1199_v0 }
 0x5b9   :  { %1047 = vmatpush3.bf16.msra.mxu1 %v1310_v17 }
 0x67f   :  { %v671_v25 = vpop.f32.mrb[12].mxu1 }
 0x680   :  { %v672_v26 = vadd.f32 %v671_v25, %v633_v24  ;;  %v1026_v27 = vpop.f32.mrb[13].mxu1 }
 0x681   :  { %v674_v11 = vpop.f32.mrb[14].mxu1 }
 0x682   :  { %1092 = vtanh.f32 %v672_v26  ;;  %v1027_v28 = vpop.f32.mrb[15].mxu1 }
 0x68c   :  { %v1093_v29 = vpop.eup %1092 }
 0x68d   :  { %v678_v30 = vpack.c.bf16 %v1093_v29, %v1093_v29 }
 0x68f   :  { %1037 = vmatmul.mubr.msk.bf16.vlgmr.msra.gmra.mrb[20].mxu0 %vm1554_vm13, %v678_v30 }
 0x690   :  { %1056 = vmatprep.mubr.msk.bf16.mxu0 %vm1548_vm7, %v1199_v0  ;;  %1053 = vmatpush3.bf16.msra.mxu0 %v1078_v36 }
 0x691   :  { %1054 = vmatprep.subr.bf16.mxu0 %v1199_v0 }
 0x694   :  { %1055 = vmatpush3.bf16.msra.mxu0 %v1079_v37 }
 0x762   :  { %v717_v16 = vpop.f32.mrb[20].mxu0 }
 0x763   :  { %v718_v31 = vadd.f32 %v717_v16, %v679_v13  ;;  %v1038_v32 = vpop.f32.mrb[21].mxu0 }
 0x764   :  { %v720_v33 = vpop.f32.mrb[22].mxu0 }
 0x765   :  { %1094 = vtanh.f32 %v718_v31  ;;  %v1039_v17 = vpop.f32.mrb[23].mxu0 }
 0x76f   :  { %v1095_v34 = vpop.eup %1094 }
 0x770   :  { %v724_v35 = vpack.c.bf16 %v1095_v34, %v1095_v34 }
 0x772   :  { %1049 = vmatmul.mubr.msk.bf16.vlgmr.msra.gmra.mrb[16].mxu1 %vm1555_vm3, %v724_v35 }
 0x845   :  { %v764_v39 = vpop.f32.mrb[16].mxu1 }
 0x846   :  { %v765_v40 = vadd.f32 %v764_v39, %v726_v38  ;;  %v1050_v41 = vpop.f32.mrb[17].mxu1 }
 0x847   :  { %v767_v42 = vpop.f32.mrb[18].mxu1 }
 0x848   :  { %1096 = vtanh.f32 %v765_v40  ;;  %v1051_v43 = vpop.f32.mrb[19].mxu1 }
 0x852   :  { %v1097_v44 = vpop.eup %1096 }
 0x853   :  { %v771_v45 = vpack.c.bf16 %v1097_v44, %v1097_v44 }
 0x855   :  { %784 = vrot.lane.b32.xlu0 %v771_v45, %s1203_s22 }
 0x8c7   :  { %v785_v46 = vpop.permute.xlu0 %784 }
 0x8c8   :  { %1057 = vmatmul.mubr.msk.bf16.vlgmr.msra.gmra.mrb[24].mxu0 %vm214_vm0, %v785_v46 }
 0x99b   :  { %v835_v0 = vpop.f32.mrb[24].mxu0 }
 0x99c   :  { %v836_v48 = vadd.f32 %v877_v47, %v835_v0  ;;  %v1058_v49 = vpop.f32.mrb[25].mxu0 }
 0x99d   :  { %v838_v50 = vpop.f32.mrb[26].mxu0 }
 0x99e   :  { %841 = vst [vmem:[#allocation9] sm:$0xff] %v836_v48  ;;  %v1059_v51 = vpop.f32.mrb[27].mxu0 }
 0x99f   :  { %1175 = shalt.err (!%p1172_p0)
}
 0x9a0   :  { %s1176_s6 = scalar_lea.hbm %s1537_s7, 128 }
 0x9a1   :  { %p1177_p1 = scmp.ne.s32.totalorder %s1537_s7, %s1176_s6  ;;  %p1180_p2 = scmp.lt.u32.totalorder %s1176_s6, %s1537_s7 }
 0x9a3   :  { %p1182_p3 = pnand %p1180_p2, %p1177_p1 }
 0x9a5   :  { %1185 = shalt.err (!%p1182_p3)
}
 0x9a6   :  { %851 = dma.vmem_to_hbm [thread:$0]  %s849_s1, 128, %s1537_s7, [#allocation5]  }
 0x9a7   :  { %1190 = dma.done.wait [#allocation5], 128  }
 0x9a8   :  { %1191 = vsyncadd [#allocation5], 4294967168 }
 0x9a9   :  { %855 = vsyncpa [#allocation4], 1 }
 0x9aa   :  { %856 = vsyncpa [#allocation7], 1 }
 0x9ab   :  { %857 = vsyncpa [#allocation5], 1 }

</bundles_post_ra>
